<compile_context>
chip_gen: v6e
topology: v6e:2x2x1
jax: 0.10.0
libtpu: 0.0.40
codegen_flags: <defaults>
</compile_context>

<pallas_src>
import jax
import jax.numpy as jnp
from jax.experimental import pallas as pl
from jax.experimental.pallas import tpu as pltpu


def _round_up(x, m):
    return ((x + m - 1) // m) * m


def _mlp_kernel(x_ref, lab_ref,
                emb_ref, w1x_ref,
                w2_ref, b2_ref,
                w3_ref, b3_ref,
                w4_ref, b4_ref,
                o_ref):
    tile = x_ref.shape[0]
    ncls_pad = emb_ref.shape[0]

    # Layer-1 label contribution: one_hot(labels) @ (label_emb @ W1_emb + b1).
    # The gather is done on the MXU from a tiny resident f32 table, so no
    # (B, 512) gather result ever round-trips through HBM.
    onehot = (lab_ref[...] ==
              jax.lax.broadcasted_iota(jnp.int32, (tile, ncls_pad), 1)
              ).astype(jnp.float32)
    h = jnp.dot(onehot, emb_ref[...], preferred_element_type=jnp.float32)

    # Layer-1 x contribution: bf16 operands, f32 accumulation on the MXU.
    h = h + jnp.dot(x_ref[...].astype(jnp.bfloat16), w1x_ref[...],
                    preferred_element_type=jnp.float32)
    h = jnp.maximum(h, 0.0).astype(jnp.bfloat16)          # bf16 inter-layer temp

    h = jnp.dot(h, w2_ref[...], preferred_element_type=jnp.float32) + b2_ref[...]
    h = jnp.maximum(h, 0.0).astype(jnp.bfloat16)

    h = jnp.dot(h, w3_ref[...], preferred_element_type=jnp.float32) + b3_ref[...]
    h = jnp.maximum(h, 0.0).astype(jnp.bfloat16)

    out = jnp.dot(h, w4_ref[...], preferred_element_type=jnp.float32) + b4_ref[...]
    o_ref[...] = out.astype(o_ref.dtype)


def prepare_params(params):
    """One-time parameter prep (hoisted out of the per-call forward).

    Splits layer 1 into an x part and a precomputed label-embedding part,
    casts weights to bf16, and lane-pads the ragged output dim.
    """
    emb = params["label_emb"].astype(jnp.float32)          # (nclass, nclass)
    w1 = params["w1"].astype(jnp.float32)                  # (in_dim+nclass, 512)
    b1 = params["b1"].astype(jnp.float32).reshape(1, -1)   # (1, 512)
    nclass = emb.shape[0]
    in_dim = w1.shape[0] - nclass

    # Fold embedding-matrix @ W1_emb + b1 into one small f32 table; pad its
    # contraction dim to 128 so the in-kernel one-hot matmul is lane-dense.
    ncls_pad = max(128, _round_up(nclass, 128))
    emb_table = emb @ w1[in_dim:, :] + b1                  # (nclass, 512)
    emb_table = jnp.pad(emb_table, ((0, ncls_pad - nclass), (0, 0)))

    w4 = params["w4"].astype(jnp.float32)
    b4 = params["b4"].astype(jnp.float32).reshape(1, -1)
    dout = w4.shape[1]
    dout_pad = _round_up(dout, 128)

    return {
        "in_dim": in_dim,
        "nclass": nclass,
        "out_dim": dout,
        "out_dim_pad": dout_pad,
        "emb_table": emb_table,                                        # f32
        "w1x": w1[:in_dim, :].astype(jnp.bfloat16),                    # (in_dim, 512)
        "w2": params["w2"].astype(jnp.bfloat16),
        "b2": params["b2"].astype(jnp.float32).reshape(1, -1),
        "w3": params["w3"].astype(jnp.bfloat16),
        "b3": params["b3"].astype(jnp.float32).reshape(1, -1),
        "w4": jnp.pad(w4, ((0, 0), (0, dout_pad - dout))).astype(jnp.bfloat16),
        "b4": jnp.pad(b4, ((0, 0), (0, dout_pad - dout))),
    }


def _pick_tile(B, batch_tile):
    # bf16 sublane packing -> multiples of 16, never 8.
    b16 = _round_up(B, 16)
    if b16 <= 256:
        return b16                                # single step; latency-bound
    # Large batch: at least 2 grid steps so both v7x TensorCores get work,
    # tile a multiple of 128, capped at batch_tile.
    half = _round_up((b16 + 1) // 2, 128)
    return max(128, min(batch_tile, half))


def generator_forward(prepared, x, labels, *, batch_tile=1024):
    """Pallas implementation of Generator.forward.

    prepared: output of prepare_params(params)
    x:        (B, in_dim)  float32
    labels:   (B,)         int32
    returns   (B, out_dim) float32
    """
    B = x.shape[0]
    in_dim = prepared["in_dim"]
    dout = prepared["out_dim"]
    dout_pad = prepared["out_dim_pad"]
    assert x.shape[1] == in_dim

    tile = _pick_tile(B, batch_tile)
    B_pad = _round_up(B, tile)
    grid = (B_pad // tile,)

    xin = x.astype(jnp.float32)
    lab = jnp.asarray(labels, jnp.int32).reshape(B, 1)
    if B_pad != B:
        xin = jnp.pad(xin, ((0, B_pad - B), (0, 0)))
        lab = jnp.pad(lab, ((0, B_pad - B), (0, 0)))

    emb_t = prepared["emb_table"]
    w1x = prepared["w1x"]
    w2, b2 = prepared["w2"], prepared["b2"]
    w3, b3 = prepared["w3"], prepared["b3"]
    w4, b4 = prepared["w4"], prepared["b4"]
    H1, H2, H3 = w1x.shape[1], w2.shape[1], w3.shape[1]

    # Grid-invariant operands: whole array resident in VMEM, DMA'd once.
    resident = pl.BlockSpec(memory_space=pltpu.MemorySpace.VMEM)

    flops = 2 * B_pad * (emb_t.shape[0] * H1 + in_dim * H1
                         + H1 * H2 + H2 * H3 + H3 * dout_pad)
    bytes_accessed = (
        xin.size * 4 + lab.size * 4
        + emb_t.size * 4
        + (w1x.size + w2.size + w3.size + w4.size) * 2
        + (b2.size + b3.size + b4.size) * 4
        + B_pad * dout_pad * 4)
    cost = pl.CostEstimate(flops=flops, transcendentals=0,
                           bytes_accessed=bytes_accessed)

    out_padded = pl.pallas_call(
        _mlp_kernel,
        out_shape=jax.ShapeDtypeStruct((B_pad, dout_pad), jnp.float32),
        grid_spec=pltpu.PrefetchScalarGridSpec(
            num_scalar_prefetch=0,
            grid=grid,
            in_specs=[
                pl.BlockSpec((tile, in_dim), lambda i: (i, 0)),  # x tile (f32)
                pl.BlockSpec((tile, 1), lambda i: (i, 0)),       # labels tile
                resident,              # emb_table (f32, includes b1)
                resident,              # w1x
                resident, resident,    # w2, b2
                resident, resident,    # w3, b3
                resident, resident,    # w4, b4
            ],
            out_specs=pl.BlockSpec((tile, dout_pad), lambda i: (i, 0)),
        ),
        compiler_params=pltpu.CompilerParams(
            dimension_semantics=("parallel",)),
        cost_estimate=cost,
    )(xin, lab, emb_t, w1x, w2, b2, w3, b3, w4, b4)

    return out_padded[:B, :dout]


def init_params(key, in_dim, out_dim, nclass):
    """Deterministic synthetic parameters (shapes match the nn.Module)."""
    ks = jax.random.split(key, 9)

    def linear(kw, kb, fan_in, fan_out):
        # PyTorch-style uniform(-1/sqrt(fan_in), 1/sqrt(fan_in)); stored as
        # (fan_in, fan_out) so the kernel does x @ W + b (W = W_pt.T).
        bound = 1.0 / jnp.sqrt(jnp.float32(fan_in))
        w = jax.random.uniform(kw, (fan_in, fan_out), jnp.float32, -bound, bound)
        b = jax.random.uniform(kb, (1, fan_out), jnp.float32, -bound, bound)
        return w, b

    w1, b1 = linear(ks[0], ks[1], in_dim + nclass, 512)
    w2, b2 = linear(ks[2], ks[3], 512, 256)
    w3, b3 = linear(ks[4], ks[5], 256, 512)
    w4, b4 = linear(ks[6], ks[7], 512, out_dim)
    label_emb = jax.random.normal(ks[8], (nclass, nclass), jnp.float32)
    return {
        "label_emb": label_emb,
        "w1": w1, "b1": b1,
        "w2": w2, "b2": b2,
        "w3": w3, "b3": b3,
        "w4": w4, "b4": b4,
    }


def _reference_forward(params, x, labels):
    """Pure-JAX f32 reference for correctness checking."""
    label_embed = jnp.take(params["label_emb"], labels, axis=0)
    h = jnp.concatenate([x, label_embed], axis=-1)
    h = jnp.maximum(h @ params["w1"] + params["b1"], 0.0)
    h = jnp.maximum(h @ params["w2"] + params["b2"], 0.0)
    h = jnp.maximum(h @ params["w3"] + params["b3"], 0.0)
    return h @ params["w4"] + params["b4"]


if __name__ == "__main__":
    in_dim, out_dim, nclass = 32, 64, 8
    batch = 16

    key = jax.random.PRNGKey(0)
    k_params, k_x, k_lab = jax.random.split(key, 3)

    params = init_params(k_params, in_dim, out_dim, nclass)
    x = jax.random.normal(k_x, (batch, in_dim), jnp.float32)
    labels = jax.random.randint(k_lab, (batch,), 0, nclass, jnp.int32)

    prepared = prepare_params(params)          # hoisted one-time weight prep
    out = generator_forward(prepared, x, labels)
    out = jax.block_until_ready(out)

    ref = _reference_forward(params, x, labels)
    assert out.shape == (batch, out_dim)
    # bf16 matmul operands with f32 accumulation -> relaxed tolerance.
    assert jnp.allclose(out, ref, atol=5e-2, rtol=5e-2), \
        float(jnp.max(jnp.abs(out - ref)))

    print("KERNEL_OK")
</pallas_src>

<mosaic_0001>
module attributes {stable_mosaic.version = 11 : i64} {
  func.func @_mlp_kernel(%arg0: i32, %arg1: memref<16x32xf32, #tpu.memory_space<vmem>>, %arg2: memref<16x1xi32, #tpu.memory_space<vmem>>, %arg3: memref<128x512xf32, #tpu.memory_space<vmem>>, %arg4: memref<32x512xbf16, #tpu.memory_space<vmem>>, %arg5: memref<512x256xbf16, #tpu.memory_space<vmem>>, %arg6: memref<1x256xf32, #tpu.memory_space<vmem>>, %arg7: memref<256x512xbf16, #tpu.memory_space<vmem>>, %arg8: memref<1x512xf32, #tpu.memory_space<vmem>>, %arg9: memref<512x128xbf16, #tpu.memory_space<vmem>>, %arg10: memref<1x128xf32, #tpu.memory_space<vmem>>, %arg11: memref<16x128xf32, #tpu.memory_space<vmem>>) attributes {dimension_semantics = [#tpu.dimension_semantics<parallel>], iteration_bounds = array<i64: 1>, scalar_prefetch = 0 : i64, scratch_operands = 0 : i64, tpu.core_type = #tpu.core_type<tc>, window_params = [{transform_indices = @transform_0, window_bounds = array<i64: 16, 32>}, {transform_indices = @transform_1, window_bounds = array<i64: 16, 1>}, {pipeline_mode = #tpu.pipeline_mode<synchronous>, transform_indices = @transform_2, window_bounds = array<i64: 128, 512>}, {pipeline_mode = #tpu.pipeline_mode<synchronous>, transform_indices = @transform_3, window_bounds = array<i64: 32, 512>}, {pipeline_mode = #tpu.pipeline_mode<synchronous>, transform_indices = @transform_4, window_bounds = array<i64: 512, 256>}, {pipeline_mode = #tpu.pipeline_mode<synchronous>, transform_indices = @transform_5, window_bounds = array<i64: 1, 256>}, {pipeline_mode = #tpu.pipeline_mode<synchronous>, transform_indices = @transform_6, window_bounds = array<i64: 256, 512>}, {pipeline_mode = #tpu.pipeline_mode<synchronous>, transform_indices = @transform_7, window_bounds = array<i64: 1, 512>}, {pipeline_mode = #tpu.pipeline_mode<synchronous>, transform_indices = @transform_8, window_bounds = array<i64: 512, 128>}, {pipeline_mode = #tpu.pipeline_mode<synchronous>, transform_indices = @transform_9, window_bounds = array<i64: 1, 128>}, {transform_indices = @transform_10, window_bounds = array<i64: 16, 128>}]} {
    %c0 = arith.constant 0 : index
    %c0_0 = arith.constant 0 : index
    %0 = vector.load %arg2[%c0, %c0_0] : memref<16x1xi32, #tpu.memory_space<vmem>>, vector<16x1xi32>
    %1 = tpu.iota {dimensions = array<i32: 1>} : vector<16x128xi32>
    %2 = vector.broadcast %0 : vector<16x1xi32> to vector<16x128xi32>
    %3 = arith.cmpi eq, %2, %1 : vector<16x128xi32>
    %4 = arith.extui %3 : vector<16x128xi1> to vector<16x128xi32>
    %5 = arith.sitofp %4 : vector<16x128xi32> to vector<16x128xf32>
    %c0_1 = arith.constant 0 : index
    %c0_2 = arith.constant 0 : index
    %6 = vector.load %arg3[%c0_1, %c0_2] : memref<128x512xf32, #tpu.memory_space<vmem>>, vector<128x512xf32>
    %cst = arith.constant dense<0.000000e+00> : vector<16x512xf32>
    %7 = tpu.matmul %5, %6, %cst {dimension_numbers = #tpu.dot_dimension_numbers<[1], [0], [0], [1], [0, 0, 1, 1], [], []>} : vector<16x128xf32>, vector<128x512xf32>, vector<16x512xf32> -> vector<16x512xf32>
    %c0_3 = arith.constant 0 : index
    %c0_4 = arith.constant 0 : index
    %8 = vector.load %arg1[%c0_3, %c0_4] : memref<16x32xf32, #tpu.memory_space<vmem>>, vector<16x32xf32>
    %9 = arith.truncf %8 : vector<16x32xf32> to vector<16x32xbf16>
    %c0_5 = arith.constant 0 : index
    %c0_6 = arith.constant 0 : index
    %10 = vector.load %arg4[%c0_5, %c0_6] : memref<32x512xbf16, #tpu.memory_space<vmem>>, vector<32x512xbf16>
    %cst_7 = arith.constant dense<0.000000e+00> : vector<16x512xf32>
    %11 = tpu.matmul %9, %10, %cst_7 {dimension_numbers = #tpu.dot_dimension_numbers<[1], [0], [0], [1], [0, 0, 1, 1], [], []>} : vector<16x32xbf16>, vector<32x512xbf16>, vector<16x512xf32> -> vector<16x512xf32>
    %12 = arith.addf %7, %11 : vector<16x512xf32>
    %cst_8 = arith.constant 0.000000e+00 : f32
    %13 = vector.broadcast %cst_8 : f32 to vector<16x512xf32>
    %14 = arith.maximumf %12, %13 : vector<16x512xf32>
    %15 = arith.truncf %14 : vector<16x512xf32> to vector<16x512xbf16>
    %c0_9 = arith.constant 0 : index
    %c0_10 = arith.constant 0 : index
    %16 = vector.load %arg5[%c0_9, %c0_10] : memref<512x256xbf16, #tpu.memory_space<vmem>>, vector<512x256xbf16>
    %cst_11 = arith.constant dense<0.000000e+00> : vector<16x256xf32>
    %17 = tpu.matmul %15, %16, %cst_11 {dimension_numbers = #tpu.dot_dimension_numbers<[1], [0], [0], [1], [0, 0, 1, 1], [], []>} : vector<16x512xbf16>, vector<512x256xbf16>, vector<16x256xf32> -> vector<16x256xf32>
    %c0_12 = arith.constant 0 : index
    %c0_13 = arith.constant 0 : index
    %18 = vector.load %arg6[%c0_12, %c0_13] : memref<1x256xf32, #tpu.memory_space<vmem>>, vector<1x256xf32>
    %19 = vector.broadcast %18 : vector<1x256xf32> to vector<16x256xf32>
    %20 = arith.addf %17, %19 : vector<16x256xf32>
    %cst_14 = arith.constant 0.000000e+00 : f32
    %21 = vector.broadcast %cst_14 : f32 to vector<16x256xf32>
    %22 = arith.maximumf %20, %21 : vector<16x256xf32>
    %23 = arith.truncf %22 : vector<16x256xf32> to vector<16x256xbf16>
    %c0_15 = arith.constant 0 : index
    %c0_16 = arith.constant 0 : index
    %24 = vector.load %arg7[%c0_15, %c0_16] : memref<256x512xbf16, #tpu.memory_space<vmem>>, vector<256x512xbf16>
    %cst_17 = arith.constant dense<0.000000e+00> : vector<16x512xf32>
    %25 = tpu.matmul %23, %24, %cst_17 {dimension_numbers = #tpu.dot_dimension_numbers<[1], [0], [0], [1], [0, 0, 1, 1], [], []>} : vector<16x256xbf16>, vector<256x512xbf16>, vector<16x512xf32> -> vector<16x512xf32>
    %c0_18 = arith.constant 0 : index
    %c0_19 = arith.constant 0 : index
    %26 = vector.load %arg8[%c0_18, %c0_19] : memref<1x512xf32, #tpu.memory_space<vmem>>, vector<1x512xf32>
    %27 = vector.broadcast %26 : vector<1x512xf32> to vector<16x512xf32>
    %28 = arith.addf %25, %27 : vector<16x512xf32>
    %cst_20 = arith.constant 0.000000e+00 : f32
    %29 = vector.broadcast %cst_20 : f32 to vector<16x512xf32>
    %30 = arith.maximumf %28, %29 : vector<16x512xf32>
    %31 = arith.truncf %30 : vector<16x512xf32> to vector<16x512xbf16>
    %c0_21 = arith.constant 0 : index
    %c0_22 = arith.constant 0 : index
    %32 = vector.load %arg9[%c0_21, %c0_22] : memref<512x128xbf16, #tpu.memory_space<vmem>>, vector<512x128xbf16>
    %cst_23 = arith.constant dense<0.000000e+00> : vector<16x128xf32>
    %33 = tpu.matmul %31, %32, %cst_23 {dimension_numbers = #tpu.dot_dimension_numbers<[1], [0], [0], [1], [0, 0, 1, 1], [], []>} : vector<16x512xbf16>, vector<512x128xbf16>, vector<16x128xf32> -> vector<16x128xf32>
    %c0_24 = arith.constant 0 : index
    %c0_25 = arith.constant 0 : index
    %34 = vector.load %arg10[%c0_24, %c0_25] : memref<1x128xf32, #tpu.memory_space<vmem>>, vector<1x128xf32>
    %35 = vector.broadcast %34 : vector<1x128xf32> to vector<16x128xf32>
    %36 = arith.addf %33, %35 : vector<16x128xf32>
    %c0_26 = arith.constant 0 : index
    %c0_27 = arith.constant 0 : index
    %37 = vector.load %arg11[%c0_26, %c0_27] : memref<16x128xf32, #tpu.memory_space<vmem>>, vector<16x128xf32>
    tpu.vector_store %arg11[%c0_26, %c0_27], %36 {strides = array<i32>} : memref<16x128xf32, #tpu.memory_space<vmem>>, vector<16x128xf32>,
    return
  }
  func.func @transform_0(%arg0: i32) -> (i32, i32) {
    %c0_i32 = arith.constant 0 : i32
    %c0_i32_0 = arith.constant 0 : i32
    return %arg0, %c0_i32 : i32, i32
  }
  func.func @transform_1(%arg0: i32) -> (i32, i32) {
    %c0_i32 = arith.constant 0 : i32
    %c0_i32_0 = arith.constant 0 : i32
    return %arg0, %c0_i32 : i32, i32
  }
  func.func @transform_2(%arg0: i32) -> (i32, i32) {
    %c0_i32 = arith.constant 0 : i32
    %c0_i32_0 = arith.constant 0 : i32
    %c0_i32_1 = arith.constant 0 : i32
    return %c0_i32, %c0_i32_0 : i32, i32
  }
  func.func @transform_3(%arg0: i32) -> (i32, i32) {
    %c0_i32 = arith.constant 0 : i32
    %c0_i32_0 = arith.constant 0 : i32
    %c0_i32_1 = arith.constant 0 : i32
    return %c0_i32, %c0_i32_0 : i32, i32
  }
  func.func @transform_4(%arg0: i32) -> (i32, i32) {
    %c0_i32 = arith.constant 0 : i32
    %c0_i32_0 = arith.constant 0 : i32
    %c0_i32_1 = arith.constant 0 : i32
    return %c0_i32, %c0_i32_0 : i32, i32
  }
  func.func @transform_5(%arg0: i32) -> (i32, i32) {
    %c0_i32 = arith.constant 0 : i32
    %c0_i32_0 = arith.constant 0 : i32
    %c0_i32_1 = arith.constant 0 : i32
    return %c0_i32, %c0_i32_0 : i32, i32
  }
  func.func @transform_6(%arg0: i32) -> (i32, i32) {
    %c0_i32 = arith.constant 0 : i32
    %c0_i32_0 = arith.constant 0 : i32
    %c0_i32_1 = arith.constant 0 : i32
    return %c0_i32, %c0_i32_0 : i32, i32
  }
  func.func @transform_7(%arg0: i32) -> (i32, i32) {
    %c0_i32 = arith.constant 0 : i32
    %c0_i32_0 = arith.constant 0 : i32
    %c0_i32_1 = arith.constant 0 : i32
    return %c0_i32, %c0_i32_0 : i32, i32
  }
  func.func @transform_8(%arg0: i32) -> (i32, i32) {
    %c0_i32 = arith.constant 0 : i32
    %c0_i32_0 = arith.constant 0 : i32
    %c0_i32_1 = arith.constant 0 : i32
    return %c0_i32, %c0_i32_0 : i32, i32
  }
  func.func @transform_9(%arg0: i32) -> (i32, i32) {
    %c0_i32 = arith.constant 0 : i32
    %c0_i32_0 = arith.constant 0 : i32
    %c0_i32_1 = arith.constant 0 : i32
    return %c0_i32, %c0_i32_0 : i32, i32
  }
  func.func @transform_10(%arg0: i32) -> (i32, i32) {
    %c0_i32 = arith.constant 0 : i32
    %c0_i32_0 = arith.constant 0 : i32
    return %arg0, %c0_i32 : i32, i32
  }
}

</mosaic_0001>

<bundles_post_ra>
// kernel: tpu_custom_call.1
= control target key start
LH: loop header
LB: loop body
LE: loop exit
PB: predicated region body
PF: predicated region fallthrough
CT: control target
= control target key end

     0   :  { %15 = vsyncpa [#allocation3], 0  ;;  %s2586_s0 = inlined_call_operand.vmem [shape: f32[16,32], index: 0, kind: input, shape index: {}]   ;;  %s2587_s1 = inlined_call_operand.vmem [shape: s32[16,1], index: 1, kind: input, shape index: {}]   ;;  %s2588_s2 = inlined_call_operand.hbm [shape: f32[128,512], index: 2, kind: input, shape index: {}]   ;;  %s2589_s3 = inlined_call_operand.hbm [shape: bf16[32,512], index: 3, kind: input, shape index: {}]   ;;  %s2590_s4 = inlined_call_operand.hbm [shape: bf16[512,256], index: 4, kind: input, shape index: {}]   ;;  %s2591_s5 = inlined_call_operand.vmem [shape: f32[1,256], index: 5, kind: input, shape index: {}]   ;;  %s2592_s6 = inlined_call_operand.hbm [shape: bf16[256,512], index: 6, kind: input, shape index: {}]   ;;  %s2593_s7 = inlined_call_operand.vmem [shape: f32[1,512], index: 7, kind: input, shape index: {}]   ;;  %s2594_s8 = inlined_call_operand.hbm [shape: bf16[512,128], index: 8, kind: input, shape index: {}]   ;;  %s2595_s9 = inlined_call_operand.vmem [shape: f32[1,128], index: 9, kind: input, shape index: {}]   ;;  %s2596_s10 = inlined_call_operand.hbm [shape: f32[16,128], index: 10, kind: output, shape index: {}]  }
   0x1   :  { %16 = vsyncpa [#allocation6], 0 }
   0x2   :  { %17 = vsyncpa [#allocation9], 0 }
   0x3   :  { %18 = vsyncpa [#allocation4], 0  ;;  %s2453_s13 = smov [#allocation5]  }
   0x4   :  { %s40_s14 = sshll.u32 %s2453_s13, 4  ;;  %s41_s14 = int_to_ptr.vmem [resolvable:$true] %s40_s14 }
   0x5   :  { %s2333_s15 = scalar_lea.vmem %s41_s14, 1024  ;;  %p2338_p1 = scmp.lt.s32.totalorder %s41_s14, %s41_s14 }
   0x6   :  { %p2334_p0 = scmp.ne.s32.totalorder %s41_s14, %s2333_s15  ;;  %p2339_p2 = scmp.lt.s32.totalorder %s2333_s15, %s2333_s15 }
   0x8   :  { %p2340_p3 = por %p2339_p2, %p2338_p1 }
   0xa   :  { %p2341_p4 = pnand %p2340_p3, %p2334_p0 }
   0xc   :  { %2344 = shalt.err (!%p2341_p4)
}
   0xd   :  { %s2454_s16 = smov 256   ;;  %s2455_s17 = smov 16  }
   0xe   :  { %46 = dma.hbm_to_vmem [thread:$0]  %s2589_s3, 1024, %s41_s14, [#allocation6], %s2454_s16, %s2454_s16, %s2455_s17  }
   0xf   :  { %s2456_s20 = smov [#allocation8]   ;;  %s2457_s22 = smov [#allocation2]  }
  0x10   :  { %s66_s21 = sshll.u32 %s2456_s20, 4  ;;  %s28_s23 = sshll.u32 %s2457_s22, 4  ;;  %s67_s21 = int_to_ptr.vmem [resolvable:$true] %s66_s21  ;;  %s29_s23 = int_to_ptr.vmem [resolvable:$true] %s28_s23 }
  0x11   :  { %s2353_s24 = scalar_lea.vmem %s67_s21, 8192  ;;  %p2358_p6 = scmp.lt.s32.totalorder %s67_s21, %s67_s21 }
  0x12   :  { %p2354_p5 = scmp.ne.s32.totalorder %s67_s21, %s2353_s24  ;;  %p2359_p7 = scmp.lt.s32.totalorder %s2353_s24, %s2353_s24 }
  0x14   :  { %p2360_p8 = por %p2359_p7, %p2358_p6 }
  0x16   :  { %p2361_p9 = pnand %p2360_p8, %p2354_p5 }
  0x18   :  { %2364 = shalt.err (!%p2361_p9)
}
  0x19   :  { %72 = dma.hbm_to_vmem [thread:$0]  %s2592_s6, 8192, %s67_s21, [#allocation9], %s2454_s16, %s2454_s16, %s2455_s17  }
  0x1a   :  { %s2373_s27 = scalar_lea.vmem %s29_s23, 8192  ;;  %p2378_p11 = scmp.lt.s32.totalorder %s29_s23, %s29_s23 }
  0x1b   :  { %p2374_p10 = scmp.ne.s32.totalorder %s29_s23, %s2373_s27  ;;  %p2379_p12 = scmp.lt.s32.totalorder %s2373_s27, %s2373_s27 }
  0x1d   :  { %p2380_p13 = por %p2379_p12, %p2378_p11 }
  0x1f   :  { %p2381_p0 = pnand %p2380_p13, %p2374_p10 }
  0x21   :  { %2384 = shalt.err (!%p2381_p0)
}
  0x22   :  { %s2458_s3 = smov 512   ;;  %s2459_s28 = smov 32  }
  0x23   :  { %34 = dma.hbm_to_vmem [thread:$0]  %s2588_s2, 8192, %s29_s23, [#allocation3], %s2458_s3, %s2458_s3, %s2459_s28  }
  0x24   :  { %s2460_s11 = smov [#allocation7]  }
  0x25   :  { %s52_s12 = sshll.u32 %s2460_s11, 4  ;;  %s53_s12 = int_to_ptr.vmem [resolvable:$true] %s52_s12 }
  0x26   :  { %s2393_s13 = scalar_lea.vmem %s53_s12, 8192  ;;  %p2398_p2 = scmp.lt.s32.totalorder %s53_s12, %s53_s12 }
  0x27   :  { %p2394_p1 = scmp.ne.s32.totalorder %s53_s12, %s2393_s13  ;;  %p2399_p3 = scmp.lt.s32.totalorder %s2393_s13, %s2393_s13 }
  0x29   :  { %p2400_p4 = por %p2399_p3, %p2398_p2 }
  0x2b   :  { %p2401_p5 = pnand %p2400_p4, %p2394_p1 }
  0x2d   :  { %2404 = shalt.err (!%p2401_p5)
}
  0x2e   :  { %s2461_s6 = smov 128   ;;  %s2462_s14 = smov 8  }
  0x2f   :  { %58 = dma.hbm_to_vmem [thread:$0]  %s2590_s4, 8192, %s53_s12, [#allocation6], %s2461_s6, %s2461_s6, %s2462_s14  }
  0x30   :  { %s2463_s2 = smov [#allocation10]  }
  0x31   :  { %s80_s17 = sshll.u32 %s2463_s2, 4  ;;  %s81_s17 = int_to_ptr.vmem [resolvable:$true] %s80_s17 }
  0x32   :  { %s2413_s18 = scalar_lea.vmem %s81_s17, 4096  ;;  %p2418_p7 = scmp.lt.s32.totalorder %s81_s17, %s81_s17 }
  0x33   :  { %p2414_p6 = scmp.ne.s32.totalorder %s81_s17, %s2413_s18  ;;  %p2419_p8 = scmp.lt.s32.totalorder %s2413_s18, %s2413_s18 }
  0x35   :  { %p2420_p9 = por %p2419_p8, %p2418_p7 }
  0x37   :  { %p2421_p10 = pnand %p2420_p9, %p2414_p6 }
  0x39   :  { %2424 = shalt.err (!%p2421_p10)
}
  0x3a   :  { %s2464_s19 = smov 64   ;;  %s2465_s20 = smov 4  }
  0x3b   :  { %86 = dma.hbm_to_vmem [thread:$0]  %s2594_s8, 4096, %s81_s17, [#allocation9], %s2464_s19, %s2464_s19, %s2465_s20  }
  0x3c   :  { %2445 = dma.done.wait [#allocation3], 8192  }
  0x3d   :  { %2446 = vsyncadd [#allocation3], 4294959104 }
  0x3e   :  { %2447 = dma.done.wait [#allocation6], 9216  }
  0x3f   :  { %2448 = vsyncadd [#allocation6], 4294958080 }
  0x40   :  { %2449 = dma.done.wait [#allocation9], 12288  }
  0x41   :  { %2450 = vsyncadd [#allocation9], 4294955008  ;;  %v2466_v0 = vmov 0   ;;  %v105_v1 = vld [vmem:[%s2587_s1] sm:$0xff]  ;;  %v106_v2 = vld [vmem:[%s2587_s1 + $0x8] sm:$0xff]  ;;  %vm236_vm0 = vcmask 261120  }
  0x42   :  { %2088 = vset.pattern.permute.xlu0 %v2466_v0  ;;  %272 = vmatprep.mubr.bf16.mxu0 %v2466_v0  ;;  %v2089_v3 = vld [vmem:[#allocation5 + $0x24] ss:$16 sps:$4 sm:$0xff]   ;;  %v2091_v4 = vld [vmem:[#allocation5 + $0x20] ss:$16 sps:$4 sm:$0xff]   ;;  %v2092_v5 = vld [vmem:[#allocation5 + $0x2c] ss:$16 sps:$4 sm:$0xff]  }
  0x43   :  { %315 = vmatprep.mubr.bf16.mxu1 %v2466_v0  ;;  %110 = vperm.xlu0 %2088, %v105_v1   ;;  %v2094_v6 = vld [vmem:[#allocation5 + $0x28] ss:$16 sps:$4 sm:$0xff]   ;;  %v2095_v7 = vld [vmem:[#allocation5 + $0x4] ss:$16 sps:$4 sm:$0xff]   ;;  %v2097_v8 = vld [vmem:[#allocation5] ss:$16 sps:$4 sm:$0xff]  }
  0x44   :  { %252 = vmatprep.subr.bf16.mxu0 %v2089_v3  ;;  %295 = vmatprep.subr.bf16.mxu1 %v2092_v5  ;;  %v2098_v9 = vld [vmem:[#allocation5 + $0xc] ss:$16 sps:$4 sm:$0xff]   ;;  %v2100_v10 = vld [vmem:[#allocation5 + $0x8] ss:$16 sps:$4 sm:$0xff]   ;;  %v185_v11 = vld [vmem:[%s2586_s0] sm:$0xff]  ;;  %s2469_s30 = smov [#allocation11]  }
  0x45   :  { %253 = vmatpush1.bf16.msra.mxu0 %v2091_v4  ;;  %296 = vmatpush1.bf16.msra.mxu1 %v2094_v6  ;;  %v186_v12 = vld [vmem:[%s2586_s0 + $0x8] sm:$0xff]  ;;  %v184_v15 = vld [vmem:[#allocation2 + $0x1f8] sm:$0xff]  ;;  %v181_v16 = vld [vmem:[#allocation2 + $0x1e0] sm:$0xff]  ;;  %s1836_s11 = sshll.u32 %s2469_s30, 4  ;;  %s1837_s11 = int_to_ptr.vmem [resolvable:$true] %s1836_s11 }
  0x46   :  { %254 = vmatprep.subr.bf16.mxu0 %v2095_v7  ;;  %v182_v13 = vld [vmem:[#allocation2 + $0x1e8] sm:$0xff]  ;;  %297 = vmatprep.subr.bf16.mxu1 %v2098_v9  ;;  %v187_v14 = vpack.c.bf16 %v186_v12, %v185_v11  ;;  %v183_v17 = vld [vmem:[#allocation2 + $0x1f0] sm:$0xff]  ;;  %v180_v19 = vld [vmem:[#allocation2 + $0x1d8] sm:$0xff]  ;;  %p2430_p12 = scmp.lt.s32.totalorder %s1837_s11, %s1837_s11 }
  0x47   :  { %113 = vperm.xlu0 %2088, %v106_v2   ;;  %v178_v18 = vld [vmem:[#allocation2 + $0x1c8] sm:$0xff]  ;;  %v177_v20 = vld [vmem:[#allocation2 + $0x1c0] sm:$0xff]  ;;  %v179_v21 = vld [vmem:[#allocation2 + $0x1d0] sm:$0xff] }
  0x48   :  { %v174_v22 = vld [vmem:[#allocation2 + $0x1a8] sm:$0xff]  ;;  %v176_v23 = vld [vmem:[#allocation2 + $0x1b8] sm:$0xff]  ;;  %v173_v24 = vld [vmem:[#allocation2 + $0x1a0] sm:$0xff] }
  0x49   :  { %255 = vmatpush1.bf16.msra.mxu0 %v2097_v8  ;;  %298 = vmatpush1.bf16.msra.mxu1 %v2100_v10  ;;  %v175_v25 = vld [vmem:[#allocation2 + $0x1b0] sm:$0xff]  ;;  %v170_v26 = vld [vmem:[#allocation2 + $0x188] sm:$0xff]  ;;  %v172_v27 = vld [vmem:[#allocation2 + $0x198] sm:$0xff] }
  0x4a   :  { %326 = vmatprep.subr.mxu0 %v182_v13  ;;  %403 = vmatprep.subr.mxu1 %v184_v15  ;;  %v169_v28 = vld [vmem:[#allocation2 + $0x180] sm:$0xff]  ;;  %v171_v29 = vld [vmem:[#allocation2 + $0x190] sm:$0xff]  ;;  %v166_v30 = vld [vmem:[#allocation2 + $0x168] sm:$0xff] }
  0x4b   :  { %v168_v31 = vld [vmem:[#allocation2 + $0x178] sm:$0xff]  ;;  %v165_v32 = vld [vmem:[#allocation2 + $0x160] sm:$0xff]  ;;  %v167_v33 = vld [vmem:[#allocation2 + $0x170] sm:$0xff] }
  0x4c   :  { %1860 = vmatmul.mubr.msk.bf16.vlgmr.msra.gmra.mxu0 %vm236_vm0, %v187_v14  ;;  %1861 = vmatmul.mubr.msk.bf16.vlgmr.msra.gmra.mxu1 %vm236_vm0, %v187_v14  ;;  %v162_v34 = vld [vmem:[#allocation2 + $0x148] sm:$0xff]  ;;  %v164_v35 = vld [vmem:[#allocation2 + $0x158] sm:$0xff]  ;;  %v161_v36 = vld [vmem:[#allocation2 + $0x140] sm:$0xff] }
  0x4d   :  { %327 = vmatpush1.msra.mxu0 %v181_v16  ;;  %404 = vmatpush1.msra.mxu1 %v183_v17  ;;  %v163_v37 = vld [vmem:[#allocation2 + $0x150] sm:$0xff]  ;;  %v158_v38 = vld [vmem:[#allocation2 + $0x128] sm:$0xff]  ;;  %v160_v39 = vld [vmem:[#allocation2 + $0x138] sm:$0xff]  ;;  %v2467_v16 = vmov 0.0   ;;  %v107_v17 = vlaneseq }
  0x4e   :  { %328 = vmatprep.subr.mxu0 %v178_v18  ;;  %405 = vmatprep.subr.mxu1 %v180_v19  ;;  %v157_v40 = vld [vmem:[#allocation2 + $0x120] sm:$0xff]  ;;  %v159_v41 = vld [vmem:[#allocation2 + $0x130] sm:$0xff]  ;;  %v154_v42 = vld [vmem:[#allocation2 + $0x108] sm:$0xff] }
  0x4f   :  { %329 = vmatpush1.msra.mxu0 %v177_v20  ;;  %406 = vmatpush1.msra.mxu1 %v179_v21  ;;  %v156_v43 = vld [vmem:[#allocation2 + $0x118] sm:$0xff]  ;;  %v153_v44 = vld [vmem:[#allocation2 + $0x100] sm:$0xff]  ;;  %v155_v45 = vld [vmem:[#allocation2 + $0x110] sm:$0xff]  ;;  %v108_v18 = vand.u32 127, %v107_v17 }
  0x50   :  { %330 = vmatprep.subr.mxu0 %v174_v22  ;;  %407 = vmatprep.subr.mxu1 %v176_v23  ;;  %v150_v46 = vld [vmem:[#allocation2 + $0xe8] sm:$0xff]  ;;  %v152_v47 = vld [vmem:[#allocation2 + $0xf8] sm:$0xff]  ;;  %v149_v48 = vld [vmem:[#allocation2 + $0xe0] sm:$0xff] }
  0x51   :  { %331 = vmatpush1.msra.mxu0 %v173_v24  ;;  %408 = vmatpush1.msra.mxu1 %v175_v25  ;;  %v151_v49 = vld [vmem:[#allocation2 + $0xf0] sm:$0xff]  ;;  %v146_v50 = vld [vmem:[#allocation2 + $0xc8] sm:$0xff]  ;;  %v148_v51 = vld [vmem:[#allocation2 + $0xd8] sm:$0xff]  ;;  %v2468_v24 = vmov 1.0  }
  0x52   :  { %332 = vmatprep.subr.mxu0 %v170_v26  ;;  %409 = vmatprep.subr.mxu1 %v172_v27  ;;  %v145_v52 = vld [vmem:[#allocation2 + $0xc0] sm:$0xff]  ;;  %v147_v53 = vld [vmem:[#allocation2 + $0xd0] sm:$0xff]  ;;  %v142_v54 = vld [vmem:[#allocation2 + $0xa8] sm:$0xff] }
  0x53   :  { %333 = vmatpush1.msra.mxu0 %v169_v28  ;;  %410 = vmatpush1.msra.mxu1 %v171_v29  ;;  %v144_v55 = vld [vmem:[#allocation2 + $0xb8] sm:$0xff]  ;;  %v141_v56 = vld [vmem:[#allocation2 + $0xa0] sm:$0xff]  ;;  %v143_v57 = vld [vmem:[#allocation2 + $0xb0] sm:$0xff] }
  0x54   :  { %334 = vmatprep.subr.mxu0 %v166_v30  ;;  %411 = vmatprep.subr.mxu1 %v168_v31  ;;  %v138_v58 = vld [vmem:[#allocation2 + $0x88] sm:$0xff]  ;;  %v140_v59 = vld [vmem:[#allocation2 + $0x98] sm:$0xff]  ;;  %v137_v60 = vld [vmem:[#allocation2 + $0x80] sm:$0xff] }
  0x55   :  { %335 = vmatpush1.msra.mxu0 %v165_v32  ;;  %412 = vmatpush1.msra.mxu1 %v167_v33  ;;  %v139_v61 = vld [vmem:[#allocation2 + $0x90] sm:$0xff]  ;;  %v134_v62 = vld [vmem:[#allocation2 + $0x68] sm:$0xff]  ;;  %v136_v63 = vld [vmem:[#allocation2 + $0x78] sm:$0xff] }
  0x56   :  { %336 = vmatprep.subr.mxu0 %v162_v34  ;;  %413 = vmatprep.subr.mxu1 %v164_v35  ;;  %v133_v0 = vld [vmem:[#allocation2 + $0x60] sm:$0xff]  ;;  %v135_v1 = vld [vmem:[#allocation2 + $0x70] sm:$0xff]  ;;  %v130_v2 = vld [vmem:[#allocation2 + $0x48] sm:$0xff] }
  0x57   :  { %337 = vmatpush1.msra.mxu0 %v161_v36  ;;  %414 = vmatpush1.msra.mxu1 %v163_v37  ;;  %v132_v3 = vld [vmem:[#allocation2 + $0x58] sm:$0xff]  ;;  %v129_v4 = vld [vmem:[#allocation2 + $0x40] sm:$0xff]  ;;  %v131_v5 = vld [vmem:[#allocation2 + $0x50] sm:$0xff] }
  0x58   :  { %338 = vmatprep.subr.mxu0 %v158_v38  ;;  %415 = vmatprep.subr.mxu1 %v160_v39  ;;  %v126_v6 = vld [vmem:[#allocation2 + $0x28] sm:$0xff]  ;;  %v128_v7 = vld [vmem:[#allocation2 + $0x38] sm:$0xff]  ;;  %v125_v8 = vld [vmem:[#allocation2 + $0x20] sm:$0xff] }
  0x59   :  { %339 = vmatpush1.msra.mxu0 %v157_v40  ;;  %416 = vmatpush1.msra.mxu1 %v159_v41  ;;  %v127_v9 = vld [vmem:[#allocation2 + $0x30] sm:$0xff]  ;;  %v122_v10 = vld [vmem:[#allocation2 + $0x8] sm:$0xff]  ;;  %v124_v11 = vld [vmem:[#allocation2 + $0x18] sm:$0xff] }
  0x5a   :  { %340 = vmatprep.subr.mxu0 %v154_v42  ;;  %417 = vmatprep.subr.mxu1 %v156_v43  ;;  %v121_v12 = vld [vmem:[#allocation2] sm:$0xff]  ;;  %v123_v13 = vld [vmem:[#allocation2 + $0x10] sm:$0xff] }
  0x5b   :  { %341 = vmatpush1.msra.mxu0 %v153_v44  ;;  %418 = vmatpush1.msra.mxu1 %v155_v45  ;;  %v2103_v14 = vld [vmem:[#allocation7 + $0x74] ss:$8 sps:$4 sm:$0xff]   ;;  %v2101_v20 = vld [vmem:[#allocation7 + $0x70] ss:$8 sps:$4 sm:$0xff]   ;;  %v2109_v22 = vld [vmem:[#allocation7 + $0x64] ss:$8 sps:$4 sm:$0xff]  }
  0x5c   :  { %342 = vmatprep.subr.mxu0 %v150_v46  ;;  %419 = vmatprep.subr.mxu1 %v152_v47  ;;  %v2106_v15 = vld [vmem:[#allocation7 + $0x174] ss:$8 sps:$4 sm:$0xff]   ;;  %v2104_v21 = vld [vmem:[#allocation7 + $0x170] ss:$8 sps:$4 sm:$0xff]   ;;  %v2112_v23 = vld [vmem:[#allocation7 + $0x164] ss:$8 sps:$4 sm:$0xff]  }
  0x5d   :  { %343 = vmatpush1.msra.mxu0 %v149_v48  ;;  %420 = vmatpush1.msra.mxu1 %v151_v49  ;;  %v2107_v26 = vld [vmem:[#allocation7 + $0x60] ss:$8 sps:$4 sm:$0xff]   ;;  %v2115_v28 = vld [vmem:[#allocation7 + $0x54] ss:$8 sps:$4 sm:$0xff]   ;;  %v2113_v30 = vld [vmem:[#allocation7 + $0x50] ss:$8 sps:$4 sm:$0xff]  }
  0x5e   :  { %344 = vmatprep.subr.mxu0 %v146_v50  ;;  %421 = vmatprep.subr.mxu1 %v148_v51  ;;  %v2110_v27 = vld [vmem:[#allocation7 + $0x160] ss:$8 sps:$4 sm:$0xff]   ;;  %v2118_v29 = vld [vmem:[#allocation7 + $0x154] ss:$8 sps:$4 sm:$0xff]   ;;  %v2116_v31 = vld [vmem:[#allocation7 + $0x150] ss:$8 sps:$4 sm:$0xff]  }
  0x5f   :  { %345 = vmatpush1.msra.mxu0 %v145_v52  ;;  %422 = vmatpush1.msra.mxu1 %v147_v53  ;;  %v2121_v32 = vld [vmem:[#allocation7 + $0x44] ss:$8 sps:$4 sm:$0xff]   ;;  %v2119_v34 = vld [vmem:[#allocation7 + $0x40] ss:$8 sps:$4 sm:$0xff]   ;;  %v2127_v36 = vld [vmem:[#allocation7 + $0x34] ss:$8 sps:$4 sm:$0xff]  }
  0x60   :  { %346 = vmatprep.subr.mxu0 %v142_v54  ;;  %423 = vmatprep.subr.mxu1 %v144_v55  ;;  %v2124_v33 = vld [vmem:[#allocation7 + $0x144] ss:$8 sps:$4 sm:$0xff]   ;;  %v2122_v35 = vld [vmem:[#allocation7 + $0x140] ss:$8 sps:$4 sm:$0xff]   ;;  %v2130_v37 = vld [vmem:[#allocation7 + $0x134] ss:$8 sps:$4 sm:$0xff]  }
  0x61   :  { %347 = vmatpush1.msra.mxu0 %v141_v56  ;;  %424 = vmatpush1.msra.mxu1 %v143_v57  ;;  %v2125_v38 = vld [vmem:[#allocation7 + $0x30] ss:$8 sps:$4 sm:$0xff]   ;;  %v2133_v40 = vld [vmem:[#allocation7 + $0x24] ss:$8 sps:$4 sm:$0xff]   ;;  %v2131_v42 = vld [vmem:[#allocation7 + $0x20] ss:$8 sps:$4 sm:$0xff]  }
  0x62   :  { %348 = vmatprep.subr.mxu0 %v138_v58  ;;  %425 = vmatprep.subr.mxu1 %v140_v59  ;;  %v2128_v39 = vld [vmem:[#allocation7 + $0x130] ss:$8 sps:$4 sm:$0xff]   ;;  %v2136_v41 = vld [vmem:[#allocation7 + $0x124] ss:$8 sps:$4 sm:$0xff]   ;;  %v2134_v43 = vld [vmem:[#allocation7 + $0x120] ss:$8 sps:$4 sm:$0xff]  }
  0x63   :  { %349 = vmatpush1.msra.mxu0 %v137_v60  ;;  %426 = vmatpush1.msra.mxu1 %v139_v61  ;;  %v2139_v44 = vld [vmem:[#allocation7 + $0x14] ss:$8 sps:$4 sm:$0xff]   ;;  %v2137_v46 = vld [vmem:[#allocation7 + $0x10] ss:$8 sps:$4 sm:$0xff]   ;;  %v2145_v48 = vld [vmem:[#allocation7 + $0x4] ss:$8 sps:$4 sm:$0xff]  }
  0x64   :  { %350 = vmatprep.subr.mxu0 %v134_v62  ;;  %427 = vmatprep.subr.mxu1 %v136_v63  ;;  %v2142_v45 = vld [vmem:[#allocation7 + $0x114] ss:$8 sps:$4 sm:$0xff]   ;;  %v2140_v47 = vld [vmem:[#allocation7 + $0x110] ss:$8 sps:$4 sm:$0xff]   ;;  %v2148_v49 = vld [vmem:[#allocation7 + $0x104] ss:$8 sps:$4 sm:$0xff]  }
  0x65   :  { %351 = vmatpush1.msra.mxu0 %v133_v0  ;;  %428 = vmatpush1.msra.mxu1 %v135_v1  ;;  %v2143_v50 = vld [vmem:[#allocation7] ss:$8 sps:$4 sm:$0xff]   ;;  %v2151_v52 = vld [vmem:[#allocation7 + $0xf4] ss:$8 sps:$4 sm:$0xff]   ;;  %v2149_v54 = vld [vmem:[#allocation7 + $0xf0] ss:$8 sps:$4 sm:$0xff]  }
  0x66   :  { %352 = vmatprep.subr.mxu0 %v130_v2  ;;  %429 = vmatprep.subr.mxu1 %v132_v3  ;;  %v2146_v51 = vld [vmem:[#allocation7 + $0x100] ss:$8 sps:$4 sm:$0xff]   ;;  %v2154_v53 = vld [vmem:[#allocation7 + $0x1f4] ss:$8 sps:$4 sm:$0xff]   ;;  %v2152_v55 = vld [vmem:[#allocation7 + $0x1f0] ss:$8 sps:$4 sm:$0xff]  }
  0x67   :  { %353 = vmatpush1.msra.mxu0 %v129_v4  ;;  %430 = vmatpush1.msra.mxu1 %v131_v5  ;;  %v2157_v56 = vld [vmem:[#allocation7 + $0xe4] ss:$8 sps:$4 sm:$0xff]   ;;  %v2155_v58 = vld [vmem:[#allocation7 + $0xe0] ss:$8 sps:$4 sm:$0xff]   ;;  %v2163_v60 = vld [vmem:[#allocation7 + $0xd4] ss:$8 sps:$4 sm:$0xff]  }
  0x68   :  { %354 = vmatprep.subr.mxu0 %v126_v6  ;;  %431 = vmatprep.subr.mxu1 %v128_v7  ;;  %v2160_v57 = vld [vmem:[#allocation7 + $0x1e4] ss:$8 sps:$4 sm:$0xff]   ;;  %v2158_v59 = vld [vmem:[#allocation7 + $0x1e0] ss:$8 sps:$4 sm:$0xff]   ;;  %v2166_v61 = vld [vmem:[#allocation7 + $0x1d4] ss:$8 sps:$4 sm:$0xff]  }
  0x69   :  { %355 = vmatpush1.msra.mxu0 %v125_v8  ;;  %432 = vmatpush1.msra.mxu1 %v127_v9  ;;  %v2161_v62 = vld [vmem:[#allocation7 + $0xd0] ss:$8 sps:$4 sm:$0xff]   ;;  %v2169_v0 = vld [vmem:[#allocation7 + $0xc4] ss:$8 sps:$4 sm:$0xff]   ;;  %v2167_v2 = vld [vmem:[#allocation7 + $0xc0] ss:$8 sps:$4 sm:$0xff]  }
  0x6a   :  { %356 = vmatprep.subr.mxu0 %v122_v10  ;;  %433 = vmatprep.subr.mxu1 %v124_v11  ;;  %v2164_v63 = vld [vmem:[#allocation7 + $0x1d0] ss:$8 sps:$4 sm:$0xff]   ;;  %v2172_v1 = vld [vmem:[#allocation7 + $0x1c4] ss:$8 sps:$4 sm:$0xff]   ;;  %v2170_v3 = vld [vmem:[#allocation7 + $0x1c0] ss:$8 sps:$4 sm:$0xff]  }
  0x6b   :  { %357 = vmatpush1.msra.mxu0 %v121_v12  ;;  %390 = vmatprep.mubr.f32.mxu0 %v2467_v16  ;;  %v2175_v4 = vld [vmem:[#allocation7 + $0xb4] ss:$8 sps:$4 sm:$0xff]   ;;  %v2173_v6 = vld [vmem:[#allocation7 + $0xb0] ss:$8 sps:$4 sm:$0xff]   ;;  %v2181_v8 = vld [vmem:[#allocation7 + $0xa4] ss:$8 sps:$4 sm:$0xff]  }
  0x6c   :  { %434 = vmatpush1.msra.mxu1 %v123_v13  ;;  %467 = vmatprep.mubr.f32.mxu1 %v2467_v16  ;;  %v2178_v5 = vld [vmem:[#allocation7 + $0x1b4] ss:$8 sps:$4 sm:$0xff]   ;;  %v2176_v7 = vld [vmem:[#allocation7 + $0x1b0] ss:$8 sps:$4 sm:$0xff]   ;;  %v2184_v9 = vld [vmem:[#allocation7 + $0x1a4] ss:$8 sps:$4 sm:$0xff]  }
  0x6d   :  { %888 = vmatprep.subr.bf16.mxu0 %v2103_v14  ;;  %931 = vmatprep.subr.bf16.mxu1 %v2106_v15  ;;  %v2179_v10 = vld [vmem:[#allocation7 + $0xa0] ss:$8 sps:$4 sm:$0xff]   ;;  %v2187_v12 = vld [vmem:[#allocation7 + $0x94] ss:$8 sps:$4 sm:$0xff]   ;;  %v2185_v14 = vld [vmem:[#allocation7 + $0x90] ss:$8 sps:$4 sm:$0xff]  }
  0x6e   :  { %v2182_v11 = vld [vmem:[#allocation7 + $0x1a0] ss:$8 sps:$4 sm:$0xff]   ;;  %v2190_v13 = vld [vmem:[#allocation7 + $0x194] ss:$8 sps:$4 sm:$0xff]   ;;  %v2188_v15 = vld [vmem:[#allocation7 + $0x190] ss:$8 sps:$4 sm:$0xff]  }
  0xbe   :  { %v111_v19 = vpop.permute.xlu0 %110 }
  0xbf   :  { %vm115_vm1 = vcmp.eq.s32.totalorder %v111_v19, %v108_v18  ;;  %v2191_v19 = vld [vmem:[#allocation7 + $0x80] ss:$8 sps:$4 sm:$0xff]  }
  0xc0   :  { %1862 = vmatmul.mubr.msk.f32.vlgmr.msra.gmra.mxu0 %vm115_vm1, %v2468_v24  ;;  %1864 = vmatmul.mubr.msk.f32.vlgmr.msra.gmra.mxu1 %vm115_vm1, %v2468_v24 }
  0xc1   :  { %396 = vmatprep.mubr.f32.mxu0 %v2467_v16  ;;  %473 = vmatprep.mubr.f32.mxu1 %v2467_v16  ;;  %v2193_v16 = vld [vmem:[#allocation7 + $0x84] ss:$8 sps:$4 sm:$0xff]  }
  0xc2   :  { %v114_v25 = vpop.permute.xlu0 %113  ;;  %889 = vmatpush1.bf16.msra.mxu0 %v2101_v20  ;;  %932 = vmatpush1.bf16.msra.mxu1 %v2104_v21  ;;  %v2194_v20 = vld [vmem:[#allocation7 + $0x180] ss:$8 sps:$4 sm:$0xff]   ;;  %v2199_v21 = vld [vmem:[#allocation8 + $0xe4] ss:$16 sps:$4 sm:$0xff]  }
  0xc3   :  { %vm116_vm2 = vcmp.eq.s32.totalorder %v114_v25, %v108_v18  ;;  %890 = vmatprep.subr.bf16.mxu0 %v2109_v22  ;;  %933 = vmatprep.subr.bf16.mxu1 %v2112_v23  ;;  %v2196_v18 = vld [vmem:[#allocation7 + $0x184] ss:$8 sps:$4 sm:$0xff]  }
  0xc4   :  { %1863 = vmatmul.mubr.msk.f32.gmra.mxu0 %vm116_vm2, %v2468_v24  ;;  %1865 = vmatmul.mubr.msk.f32.gmra.mxu1 %vm116_vm2, %v2468_v24  ;;  %v2202_v22 = vld [vmem:[#allocation8 + $0xec] ss:$16 sps:$4 sm:$0xff]  }
  0xc6   :  { %891 = vmatpush1.bf16.msra.mxu0 %v2107_v26  ;;  %934 = vmatpush1.bf16.msra.mxu1 %v2110_v27 }
  0xc7   :  { %892 = vmatprep.subr.bf16.mxu0 %v2115_v28  ;;  %935 = vmatprep.subr.bf16.mxu1 %v2118_v29 }
  0xca   :  { %893 = vmatpush1.bf16.msra.mxu0 %v2113_v30  ;;  %936 = vmatpush1.bf16.msra.mxu1 %v2116_v31 }
  0xcb   :  { %894 = vmatprep.subr.bf16.mxu0 %v2121_v32  ;;  %937 = vmatprep.subr.bf16.mxu1 %v2124_v33 }
  0xce   :  { %895 = vmatpush1.bf16.msra.mxu0 %v2119_v34  ;;  %938 = vmatpush1.bf16.msra.mxu1 %v2122_v35 }
  0xcf   :  { %896 = vmatprep.subr.bf16.mxu0 %v2127_v36  ;;  %939 = vmatprep.subr.bf16.mxu1 %v2130_v37 }
  0xd2   :  { %897 = vmatpush1.bf16.msra.mxu0 %v2125_v38  ;;  %940 = vmatpush1.bf16.msra.mxu1 %v2128_v39 }
  0xd3   :  { %898 = vmatprep.subr.bf16.mxu0 %v2133_v40  ;;  %941 = vmatprep.subr.bf16.mxu1 %v2136_v41 }
  0xd6   :  { %899 = vmatpush1.bf16.msra.mxu0 %v2131_v42  ;;  %942 = vmatpush1.bf16.msra.mxu1 %v2134_v43 }
  0xd7   :  { %900 = vmatprep.subr.bf16.mxu0 %v2139_v44  ;;  %943 = vmatprep.subr.bf16.mxu1 %v2142_v45 }
  0xda   :  { %901 = vmatpush1.bf16.msra.mxu0 %v2137_v46  ;;  %944 = vmatpush1.bf16.msra.mxu1 %v2140_v47 }
  0xdb   :  { %902 = vmatprep.subr.bf16.mxu0 %v2145_v48  ;;  %945 = vmatprep.subr.bf16.mxu1 %v2148_v49 }
  0xde   :  { %903 = vmatpush1.bf16.msra.mxu0 %v2143_v50  ;;  %946 = vmatpush1.bf16.msra.mxu1 %v2146_v51 }
  0xdf   :  { %904 = vmatprep.subr.bf16.mxu0 %v2151_v52  ;;  %947 = vmatprep.subr.bf16.mxu1 %v2154_v53 }
  0xe2   :  { %905 = vmatpush2.bf16.msra.mxu0 %v2149_v54  ;;  %948 = vmatpush2.bf16.msra.mxu1 %v2152_v55 }
  0xe3   :  { %906 = vmatprep.subr.bf16.mxu0 %v2157_v56  ;;  %949 = vmatprep.subr.bf16.mxu1 %v2160_v57  ;;  %v2197_v57 = vld [vmem:[#allocation8 + $0xe0] ss:$16 sps:$4 sm:$0xff]  }
  0xe6   :  { %907 = vmatpush2.bf16.msra.mxu0 %v2155_v58  ;;  %950 = vmatpush2.bf16.msra.mxu1 %v2158_v59  ;;  %v2200_v58 = vld [vmem:[#allocation8 + $0xe8] ss:$16 sps:$4 sm:$0xff]  }
  0xe7   :  { %908 = vmatprep.subr.bf16.mxu0 %v2163_v60  ;;  %951 = vmatprep.subr.bf16.mxu1 %v2166_v61  ;;  %v2205_v61 = vld [vmem:[#allocation8 + $0xc4] ss:$16 sps:$4 sm:$0xff]  }
  0xea   :  { %909 = vmatpush2.bf16.msra.mxu0 %v2161_v62  ;;  %952 = vmatpush2.bf16.msra.mxu1 %v2164_v63  ;;  %v2208_v62 = vld [vmem:[#allocation8 + $0xcc] ss:$16 sps:$4 sm:$0xff]   ;;  %v2203_v63 = vld [vmem:[#allocation8 + $0xc0] ss:$16 sps:$4 sm:$0xff]  }
  0xeb   :  { %910 = vmatprep.subr.bf16.mxu0 %v2169_v0  ;;  %953 = vmatprep.subr.bf16.mxu1 %v2172_v1  ;;  %v2206_v0 = vld [vmem:[#allocation8 + $0xc8] ss:$16 sps:$4 sm:$0xff]   ;;  %v2211_v1 = vld [vmem:[#allocation8 + $0xa4] ss:$16 sps:$4 sm:$0xff]  }
  0xee   :  { %911 = vmatpush2.bf16.msra.mxu0 %v2167_v2  ;;  %954 = vmatpush2.bf16.msra.mxu1 %v2170_v3  ;;  %v2214_v2 = vld [vmem:[#allocation8 + $0xac] ss:$16 sps:$4 sm:$0xff]   ;;  %v2209_v3 = vld [vmem:[#allocation8 + $0xa0] ss:$16 sps:$4 sm:$0xff]  }
  0xef   :  { %912 = vmatprep.subr.bf16.mxu0 %v2175_v4  ;;  %955 = vmatprep.subr.bf16.mxu1 %v2178_v5  ;;  %v2212_v4 = vld [vmem:[#allocation8 + $0xa8] ss:$16 sps:$4 sm:$0xff]   ;;  %v2217_v5 = vld [vmem:[#allocation8 + $0x84] ss:$16 sps:$4 sm:$0xff]  }
  0xf2   :  { %913 = vmatpush2.bf16.msra.mxu0 %v2173_v6  ;;  %956 = vmatpush2.bf16.msra.mxu1 %v2176_v7  ;;  %v2220_v6 = vld [vmem:[#allocation8 + $0x8c] ss:$16 sps:$4 sm:$0xff]   ;;  %v2215_v7 = vld [vmem:[#allocation8 + $0x80] ss:$16 sps:$4 sm:$0xff]  }
  0xf3   :  { %914 = vmatprep.subr.bf16.mxu0 %v2181_v8  ;;  %957 = vmatprep.subr.bf16.mxu1 %v2184_v9  ;;  %v2218_v8 = vld [vmem:[#allocation8 + $0x88] ss:$16 sps:$4 sm:$0xff]   ;;  %v2223_v9 = vld [vmem:[#allocation8 + $0x64] ss:$16 sps:$4 sm:$0xff]  }
  0xf6   :  { %915 = vmatpush2.bf16.msra.mxu0 %v2179_v10  ;;  %958 = vmatpush2.bf16.msra.mxu1 %v2182_v11  ;;  %v2226_v10 = vld [vmem:[#allocation8 + $0x6c] ss:$16 sps:$4 sm:$0xff]   ;;  %v2221_v11 = vld [vmem:[#allocation8 + $0x60] ss:$16 sps:$4 sm:$0xff]  }
  0xf7   :  { %916 = vmatprep.subr.bf16.mxu0 %v2187_v12  ;;  %959 = vmatprep.subr.bf16.mxu1 %v2190_v13  ;;  %v2224_v12 = vld [vmem:[#allocation8 + $0x68] ss:$16 sps:$4 sm:$0xff]   ;;  %v2229_v13 = vld [vmem:[#allocation8 + $0x44] ss:$16 sps:$4 sm:$0xff]  }
  0xfa   :  { %917 = vmatpush2.bf16.msra.mxu0 %v2185_v14  ;;  %960 = vmatpush2.bf16.msra.mxu1 %v2188_v15  ;;  %v2232_v14 = vld [vmem:[#allocation8 + $0x4c] ss:$16 sps:$4 sm:$0xff]   ;;  %v2227_v15 = vld [vmem:[#allocation8 + $0x40] ss:$16 sps:$4 sm:$0xff]  }
  0xfb   :  { %918 = vmatprep.subr.bf16.mxu0 %v2193_v16  ;;  %961 = vmatprep.subr.bf16.mxu1 %v2196_v18  ;;  %v2230_v16 = vld [vmem:[#allocation8 + $0x48] ss:$16 sps:$4 sm:$0xff]   ;;  %v2235_v18 = vld [vmem:[#allocation8 + $0x24] ss:$16 sps:$4 sm:$0xff]  }
  0xfe   :  { %919 = vmatpush2.bf16.msra.mxu0 %v2191_v19  ;;  %962 = vmatpush2.bf16.msra.mxu1 %v2194_v20  ;;  %v2238_v19 = vld [vmem:[#allocation8 + $0x2c] ss:$16 sps:$4 sm:$0xff]   ;;  %v2233_v20 = vld [vmem:[#allocation8 + $0x20] ss:$16 sps:$4 sm:$0xff]  }
  0xff   :  { %1386 = vmatprep.subr.bf16.mxu0 %v2199_v21  ;;  %1429 = vmatprep.subr.bf16.mxu1 %v2202_v22  ;;  %v2236_v21 = vld [vmem:[#allocation8 + $0x28] ss:$16 sps:$4 sm:$0xff]   ;;  %v2241_v22 = vld [vmem:[#allocation8 + $0x4] ss:$16 sps:$4 sm:$0xff]  }
 0x10c   :  { %v274_v23 = vpop.f32.mrf.mxu0  ;;  %v317_v24 = vpop.f32.mrf.mxu1 }
 0x10e   :  { %v276_v25 = vpop.f32.mrf.mxu0  ;;  %v319_v26 = vpop.f32.mrf.mxu1 }
 0x110   :  { %v278_v27 = vpop.f32.mrf.mxu0  ;;  %v321_v28 = vpop.f32.mrf.mxu1 }
 0x112   :  { %v280_v29 = vpop.f32.mrf.mxu0  ;;  %v323_v30 = vpop.f32.mrf.mxu1 }
 0x180   :  { %v392_v31 = vpop.f32.mrf.mxu0  ;;  %v469_v32 = vpop.f32.mrf.mxu1 }
 0x181   :  { %v393_v41 = vadd.f32 %v392_v31, %v274_v23  ;;  %v470_v42 = vadd.f32 %v469_v32, %v317_v24  ;;  %v2244_v23 = vld [vmem:[#allocation8 + $0xc] ss:$16 sps:$4 sm:$0xff]   ;;  %v2239_v24 = vld [vmem:[#allocation8] ss:$16 sps:$4 sm:$0xff]  }
 0x182   :  { %v394_v33 = vpop.f32.mrf.mxu0  ;;  %v471_v34 = vpop.f32.mrf.mxu1  ;;  %v2256_v31 = vld [vmem:[#allocation8 + $0x1cc] ss:$16 sps:$4 sm:$0xff]   ;;  %v2251_v32 = vld [vmem:[#allocation8 + $0x1c0] ss:$16 sps:$4 sm:$0xff]  }
 0x183   :  { %v395_v37 = vadd.f32 %v394_v33, %v276_v25  ;;  %v472_v38 = vadd.f32 %v471_v34, %v319_v26  ;;  %v480_v53 = vmax.f32 %v393_v41, 0.0  ;;  %v482_v54 = vmax.f32 %v470_v42, 0.0  ;;  %v2242_v25 = vld [vmem:[#allocation8 + $0x8] ss:$16 sps:$4 sm:$0xff]   ;;  %v2247_v26 = vld [vmem:[#allocation8 + $0x1e4] ss:$16 sps:$4 sm:$0xff]  }
 0x184   :  { %v398_v35 = vpop.f32.mrf.mxu0  ;;  %v475_v36 = vpop.f32.mrf.mxu1  ;;  %v2254_v33 = vld [vmem:[#allocation8 + $0x1c8] ss:$16 sps:$4 sm:$0xff]   ;;  %v2259_v34 = vld [vmem:[#allocation8 + $0x1a4] ss:$16 sps:$4 sm:$0xff]  }
 0x185   :  { %v399_v39 = vadd.f32 %v398_v35, %v278_v27  ;;  %v476_v40 = vadd.f32 %v475_v36, %v321_v28  ;;  %v481_v49 = vmax.f32 %v395_v37, 0.0  ;;  %v483_v50 = vmax.f32 %v472_v38, 0.0  ;;  %v2250_v27 = vld [vmem:[#allocation8 + $0x1ec] ss:$16 sps:$4 sm:$0xff]   ;;  %v2245_v28 = vld [vmem:[#allocation8 + $0x1e0] ss:$16 sps:$4 sm:$0xff]  }
 0x186   :  { %v400_v43 = vpop.f32.mrf.mxu0  ;;  %v477_v44 = vpop.f32.mrf.mxu1  ;;  %v2262_v35 = vld [vmem:[#allocation8 + $0x1ac] ss:$16 sps:$4 sm:$0xff]   ;;  %v2257_v36 = vld [vmem:[#allocation8 + $0x1a0] ss:$16 sps:$4 sm:$0xff]   ;;  %v2260_v37 = vld [vmem:[#allocation8 + $0x1a8] ss:$16 sps:$4 sm:$0xff]  }
 0x187   :  { %v401_v45 = vadd.f32 %v400_v43, %v280_v29  ;;  %v478_v46 = vadd.f32 %v477_v44, %v323_v30  ;;  %v484_v47 = vmax.f32 %v399_v39, 0.0  ;;  %v486_v48 = vmax.f32 %v476_v40, 0.0  ;;  %v2248_v29 = vld [vmem:[#allocation8 + $0x1e8] ss:$16 sps:$4 sm:$0xff]   ;;  %v2253_v30 = vld [vmem:[#allocation8 + $0x1c4] ss:$16 sps:$4 sm:$0xff]  }
 0x188   :  { %v2265_v38 = vld [vmem:[#allocation8 + $0x184] ss:$16 sps:$4 sm:$0xff]   ;;  %v2268_v39 = vld [vmem:[#allocation8 + $0x18c] ss:$16 sps:$4 sm:$0xff]   ;;  %v2263_v40 = vld [vmem:[#allocation8 + $0x180] ss:$16 sps:$4 sm:$0xff]  }
 0x189   :  { %v485_v51 = vmax.f32 %v401_v45, 0.0  ;;  %v487_v52 = vmax.f32 %v478_v46, 0.0  ;;  %v488_v59 = vpack.c.bf16 %v484_v47, %v480_v53  ;;  %v490_v60 = vpack.c.bf16 %v486_v48, %v482_v54  ;;  %v2266_v41 = vld [vmem:[#allocation8 + $0x188] ss:$16 sps:$4 sm:$0xff]   ;;  %v2271_v42 = vld [vmem:[#allocation8 + $0x164] ss:$16 sps:$4 sm:$0xff]  }
 0x18a   :  { %v2274_v43 = vld [vmem:[#allocation8 + $0x16c] ss:$16 sps:$4 sm:$0xff]   ;;  %v2269_v44 = vld [vmem:[#allocation8 + $0x160] ss:$16 sps:$4 sm:$0xff]   ;;  %v2272_v45 = vld [vmem:[#allocation8 + $0x168] ss:$16 sps:$4 sm:$0xff]  }
 0x18b   :  { %v489_v55 = vpack.c.bf16 %v485_v51, %v481_v49  ;;  %v491_v56 = vpack.c.bf16 %v487_v52, %v483_v50  ;;  %v2277_v46 = vld [vmem:[#allocation8 + $0x144] ss:$16 sps:$4 sm:$0xff]   ;;  %v2280_v47 = vld [vmem:[#allocation8 + $0x14c] ss:$16 sps:$4 sm:$0xff]   ;;  %v2275_v48 = vld [vmem:[#allocation8 + $0x140] ss:$16 sps:$4 sm:$0xff]  }
 0x18c   :  { %v2278_v49 = vld [vmem:[#allocation8 + $0x148] ss:$16 sps:$4 sm:$0xff]   ;;  %v2283_v50 = vld [vmem:[#allocation8 + $0x124] ss:$16 sps:$4 sm:$0xff]   ;;  %v2286_v51 = vld [vmem:[#allocation8 + $0x12c] ss:$16 sps:$4 sm:$0xff]  }
 0x18d   :  { %920 = vmatprep.mubr.bf16.mxu0 %v489_v55  ;;  %963 = vmatprep.mubr.bf16.mxu1 %v491_v56  ;;  %v2281_v52 = vld [vmem:[#allocation8 + $0x120] ss:$16 sps:$4 sm:$0xff]   ;;  %v2284_v53 = vld [vmem:[#allocation8 + $0x128] ss:$16 sps:$4 sm:$0xff]   ;;  %v2289_v54 = vld [vmem:[#allocation8 + $0x104] ss:$16 sps:$4 sm:$0xff]  }
 0x18e   :  { %921 = vmatmul.mubr.bf16.vlgmr.msra.gmra.mxu0 %v488_v59  ;;  %964 = vmatmul.mubr.bf16.vlgmr.msra.gmra.mxu1 %v490_v60  ;;  %v2292_v55 = vld [vmem:[#allocation8 + $0x10c] ss:$16 sps:$4 sm:$0xff]   ;;  %v2287_v56 = vld [vmem:[#allocation8 + $0x100] ss:$16 sps:$4 sm:$0xff]   ;;  %v2557_v60 = vshrl.u32 %v107_v17, 7 }
 0x18f   :  { %1387 = vmatpush1.bf16.msra.mxu0 %v2197_v57  ;;  %1430 = vmatpush1.bf16.msra.mxu1 %v2200_v58  ;;  %v2290_v57 = vld [vmem:[#allocation8 + $0x108] ss:$16 sps:$4 sm:$0xff]  }
 0x190   :  { %1388 = vmatprep.subr.bf16.mxu0 %v2205_v61  ;;  %1431 = vmatprep.subr.bf16.mxu1 %v2208_v62  ;;  %v2293_v58 = vld [vmem:[#allocation10 + $0x78] sm:$0xff]   ;;  %v564_v61 = vsub.s32 1, %v2557_v60  ;;  %v560_v62 = vsub.s32 0, %v2557_v60 }
 0x191   :  { %v2294_v59 = vld [vmem:[#allocation10 + $0xf8] sm:$0xff]  }
 0x193   :  { %1389 = vmatpush1.bf16.msra.mxu0 %v2203_v63  ;;  %1432 = vmatpush1.bf16.msra.mxu1 %v2206_v0  ;;  %v556_v63 = vld [vmem:[%s2591_s5] sm:$0x3] }
 0x194   :  { %1390 = vmatprep.subr.bf16.mxu0 %v2211_v1  ;;  %1433 = vmatprep.subr.bf16.mxu1 %v2214_v2  ;;  %v565_v0 = vrot.slane %v556_v63, %v564_v61  ;;  %v561_v1 = vrot.slane %v556_v63, %v560_v62 }
 0x197   :  { %1391 = vmatpush1.bf16.msra.mxu0 %v2209_v3  ;;  %1434 = vmatpush1.bf16.msra.mxu1 %v2212_v4 }
 0x198   :  { %1392 = vmatprep.subr.bf16.mxu0 %v2217_v5  ;;  %1435 = vmatprep.subr.bf16.mxu1 %v2220_v6 }
 0x19b   :  { %1393 = vmatpush1.bf16.msra.mxu0 %v2215_v7  ;;  %1436 = vmatpush1.bf16.msra.mxu1 %v2218_v8 }
 0x19c   :  { %1394 = vmatprep.subr.bf16.mxu0 %v2223_v9  ;;  %1437 = vmatprep.subr.bf16.mxu1 %v2226_v10 }
 0x19f   :  { %1395 = vmatpush1.bf16.msra.mxu0 %v2221_v11  ;;  %1438 = vmatpush1.bf16.msra.mxu1 %v2224_v12 }
 0x1a0   :  { %1396 = vmatprep.subr.bf16.mxu0 %v2229_v13  ;;  %1439 = vmatprep.subr.bf16.mxu1 %v2232_v14 }
 0x1a3   :  { %1397 = vmatpush1.bf16.msra.mxu0 %v2227_v15  ;;  %1440 = vmatpush1.bf16.msra.mxu1 %v2230_v16 }
 0x1a4   :  { %1398 = vmatprep.subr.bf16.mxu0 %v2235_v18  ;;  %1441 = vmatprep.subr.bf16.mxu1 %v2238_v19 }
 0x1a7   :  { %1399 = vmatpush1.bf16.msra.mxu0 %v2233_v20  ;;  %1442 = vmatpush1.bf16.msra.mxu1 %v2236_v21 }
 0x1a8   :  { %1400 = vmatprep.subr.bf16.mxu0 %v2241_v22  ;;  %1443 = vmatprep.subr.bf16.mxu1 %v2244_v23  ;;  %v2295_v23 = vld [vmem:[#allocation10 + $0x38] sm:$0xff]  }
 0x1ab   :  { %1401 = vmatpush1.bf16.msra.mxu0 %v2239_v24  ;;  %1444 = vmatpush1.bf16.msra.mxu1 %v2242_v25  ;;  %v2296_v24 = vld [vmem:[#allocation10 + $0xb8] sm:$0xff]  }
 0x1ac   :  { %1402 = vmatprep.subr.bf16.mxu0 %v2247_v26  ;;  %1445 = vmatprep.subr.bf16.mxu1 %v2250_v27  ;;  %v2297_v26 = vld [vmem:[#allocation10 + $0x70] sm:$0xff]  }
 0x1ad   :  { %v2298_v27 = vld [vmem:[#allocation10 + $0xf0] sm:$0xff]  }
 0x1af   :  { %1403 = vmatpush2.bf16.msra.mxu0 %v2245_v28  ;;  %1446 = vmatpush2.bf16.msra.mxu1 %v2248_v29  ;;  %v2299_v28 = vld [vmem:[#allocation10 + $0x30] sm:$0xff]  }
 0x1b0   :  { %1404 = vmatprep.subr.bf16.mxu0 %v2253_v30  ;;  %1447 = vmatprep.subr.bf16.mxu1 %v2256_v31  ;;  %v2300_v29 = vld [vmem:[#allocation10 + $0xb0] sm:$0xff]   ;;  %v2301_v30 = vld [vmem:[#allocation10 + $0x68] sm:$0xff]  }
 0x1b1   :  { %v2302_v31 = vld [vmem:[#allocation10 + $0xe8] sm:$0xff]  }
 0x1b3   :  { %1405 = vmatpush2.bf16.msra.mxu0 %v2251_v32  ;;  %1448 = vmatpush2.bf16.msra.mxu1 %v2254_v33  ;;  %v2303_v32 = vld [vmem:[#allocation10 + $0x28] sm:$0xff]  }
 0x1b4   :  { %1406 = vmatprep.subr.bf16.mxu0 %v2259_v34  ;;  %1449 = vmatprep.subr.bf16.mxu1 %v2262_v35  ;;  %v2304_v33 = vld [vmem:[#allocation10 + $0xa8] sm:$0xff]   ;;  %v2305_v34 = vld [vmem:[#allocation10 + $0x60] sm:$0xff]  }
 0x1b5   :  { %v2306_v35 = vld [vmem:[#allocation10 + $0xe0] sm:$0xff]  }
 0x1b7   :  { %1407 = vmatpush2.bf16.msra.mxu0 %v2257_v36  ;;  %1450 = vmatpush2.bf16.msra.mxu1 %v2260_v37  ;;  %v2307_v36 = vld [vmem:[#allocation10 + $0x20] sm:$0xff]  }
 0x1b8   :  { %1408 = vmatprep.subr.bf16.mxu0 %v2265_v38  ;;  %1451 = vmatprep.subr.bf16.mxu1 %v2268_v39  ;;  %v2308_v37 = vld [vmem:[#allocation10 + $0xa0] sm:$0xff]   ;;  %v2309_v38 = vld [vmem:[#allocation10 + $0x58] sm:$0xff]  }
 0x1b9   :  { %v2310_v39 = vld [vmem:[#allocation10 + $0xd8] sm:$0xff]  }
 0x1bb   :  { %1409 = vmatpush2.bf16.msra.mxu0 %v2263_v40  ;;  %1452 = vmatpush2.bf16.msra.mxu1 %v2266_v41  ;;  %v2311_v40 = vld [vmem:[#allocation10 + $0x18] sm:$0xff]  }
 0x1bc   :  { %1410 = vmatprep.subr.bf16.mxu0 %v2271_v42  ;;  %1453 = vmatprep.subr.bf16.mxu1 %v2274_v43  ;;  %v2312_v41 = vld [vmem:[#allocation10 + $0x98] sm:$0xff]   ;;  %v2313_v42 = vld [vmem:[#allocation10 + $0x50] sm:$0xff]  }
 0x1bd   :  { %v2314_v43 = vld [vmem:[#allocation10 + $0xd0] sm:$0xff]  }
 0x1bf   :  { %1411 = vmatpush2.bf16.msra.mxu0 %v2269_v44  ;;  %1454 = vmatpush2.bf16.msra.mxu1 %v2272_v45  ;;  %v2315_v44 = vld [vmem:[#allocation10 + $0x10] sm:$0xff]  }
 0x1c0   :  { %1412 = vmatprep.subr.bf16.mxu0 %v2277_v46  ;;  %1455 = vmatprep.subr.bf16.mxu1 %v2280_v47  ;;  %v2316_v45 = vld [vmem:[#allocation10 + $0x90] sm:$0xff]   ;;  %v2317_v46 = vld [vmem:[#allocation10 + $0x48] sm:$0xff]  }
 0x1c1   :  { %v2318_v47 = vld [vmem:[#allocation10 + $0xc8] sm:$0xff]  }
 0x1c3   :  { %1413 = vmatpush2.bf16.msra.mxu0 %v2275_v48  ;;  %1456 = vmatpush2.bf16.msra.mxu1 %v2278_v49  ;;  %v2319_v48 = vld [vmem:[#allocation10 + $0x8] sm:$0xff]  }
 0x1c4   :  { %1414 = vmatprep.subr.bf16.mxu0 %v2283_v50  ;;  %1457 = vmatprep.subr.bf16.mxu1 %v2286_v51  ;;  %v2320_v49 = vld [vmem:[#allocation10 + $0x88] sm:$0xff]   ;;  %v2321_v50 = vld [vmem:[#allocation10 + $0x40] sm:$0xff]  }
 0x1c5   :  { %v2322_v51 = vld [vmem:[#allocation10 + $0xc0] sm:$0xff]  }
 0x1c7   :  { %1415 = vmatpush2.bf16.msra.mxu0 %v2281_v52  ;;  %1458 = vmatpush2.bf16.msra.mxu1 %v2284_v53  ;;  %v2323_v52 = vld [vmem:[#allocation10] sm:$0xff]  }
 0x1c8   :  { %1416 = vmatprep.subr.bf16.mxu0 %v2289_v54  ;;  %1459 = vmatprep.subr.bf16.mxu1 %v2292_v55  ;;  %v2324_v53 = vld [vmem:[#allocation10 + $0x80] sm:$0xff]   ;;  %v1060_v54 = vsub.s32 3, %v2557_v60  ;;  %v1056_v55 = vsub.s32 2, %v2557_v60 }
 0x1cb   :  { %1417 = vmatpush2.bf16.msra.mxu0 %v2287_v56  ;;  %1460 = vmatpush2.bf16.msra.mxu1 %v2290_v57  ;;  %v1044_v56 = vld [vmem:[%s2593_s7] sm:$0xf] }
 0x1cc   :  { %2027 = vmatprep.subr.bf16.mxu0 %v2293_v58  ;;  %2049 = vmatprep.subr.bf16.mxu1 %v2294_v59  ;;  %v1053_v59 = vrot.slane %v1044_v56, %v564_v61  ;;  %v1061_v63 = vrot.slane %v1044_v56, %v1060_v54 }
 0x24e   :  { %v922_v2 = vpop.f32.mrf.mxu0  ;;  %v965_v3 = vpop.f32.mrf.mxu1 }
 0x24f   :  { %v923_v6 = vadd.f32 %v922_v2, %v561_v1 }
 0x250   :  { %v924_v4 = vpop.f32.mrf.mxu0  ;;  %v967_v5 = vpop.f32.mrf.mxu1 }
 0x251   :  { %v925_v17 = vadd.f32 %v924_v4, %v565_v0  ;;  %v966_v14 = vadd.f32 %v965_v3, %v923_v6 }
 0x252   :  { %v926_v7 = vpop.f32.mrf.mxu0  ;;  %v969_v8 = vpop.f32.mrf.mxu1 }
 0x253   :  { %v927_v9 = vadd.f32 %v926_v7, %v561_v1  ;;  %v968_v11 = vadd.f32 %v967_v5, %v925_v17  ;;  %v974_v21 = vmax.f32 %v966_v14, 0.0  ;;  %v1057_v1 = vrot.slane %v1044_v56, %v1056_v55 }
 0x254   :  { %v928_v10 = vpop.f32.mrf.mxu0  ;;  %v971_v15 = vpop.f32.mrf.mxu1 }
 0x255   :  { %v970_v12 = vadd.f32 %v969_v8, %v927_v9  ;;  %v929_v13 = vadd.f32 %v928_v10, %v565_v0  ;;  %v975_v19 = vmax.f32 %v968_v11, 0.0  ;;  %v1049_v0 = vrot.slane %v1044_v56, %v560_v62 }
 0x257   :  { %v972_v16 = vadd.f32 %v971_v15, %v929_v13  ;;  %v976_v18 = vmax.f32 %v970_v12, 0.0 }
 0x259   :  { %v977_v20 = vmax.f32 %v972_v16, 0.0  ;;  %v978_v25 = vpack.c.bf16 %v976_v18, %v974_v21 }
 0x25b   :  { %v979_v22 = vpack.c.bf16 %v977_v20, %v975_v19 }
 0x25d   :  { %1418 = vmatprep.mubr.bf16.mxu0 %v979_v22  ;;  %1461 = vmatprep.mubr.bf16.mxu1 %v979_v22 }
 0x25e   :  { %1419 = vmatmul.mubr.bf16.vlgmr.msra.gmra.mxu0 %v978_v25  ;;  %1462 = vmatmul.mubr.bf16.vlgmr.msra.gmra.mxu1 %v978_v25 }
 0x25f   :  { %2028 = vmatpush3.bf16.msra.mxu0 %v2295_v23  ;;  %2050 = vmatpush3.bf16.msra.mxu1 %v2296_v24 }
 0x260   :  { %2029 = vmatprep.subr.bf16.mxu0 %v2297_v26  ;;  %2051 = vmatprep.subr.bf16.mxu1 %v2298_v27  ;;  %v1994_v27 = vld [vmem:[%s2595_s9] ss:$0 sm:$0xff]  ;;  %s2425_s9 = scalar_lea.vmem %s1837_s11, 256 }
 0x261   :  { %p2426_p11 = scmp.ne.s32.totalorder %s1837_s11, %s2425_s9  ;;  %p2431_p13 = scmp.lt.s32.totalorder %s2425_s9, %s2425_s9 }
 0x263   :  { %2030 = vmatpush3.bf16.msra.mxu0 %v2299_v28  ;;  %2052 = vmatpush3.bf16.msra.mxu1 %v2300_v29  ;;  %p2432_p0 = por %p2431_p13, %p2430_p12 }
 0x264   :  { %2031 = vmatprep.subr.bf16.mxu0 %v2301_v30  ;;  %2053 = vmatprep.subr.bf16.mxu1 %v2302_v31 }
 0x265   :  { %p2433_p1 = pnand %p2432_p0, %p2426_p11 }
 0x267   :  { %2032 = vmatpush3.bf16.msra.mxu0 %v2303_v32  ;;  %2054 = vmatpush3.bf16.msra.mxu1 %v2304_v33 }
 0x268   :  { %2033 = vmatprep.subr.bf16.mxu0 %v2305_v34  ;;  %2055 = vmatprep.subr.bf16.mxu1 %v2306_v35 }
 0x26b   :  { %2034 = vmatpush3.bf16.msra.mxu0 %v2307_v36  ;;  %2056 = vmatpush3.bf16.msra.mxu1 %v2308_v37 }
 0x26c   :  { %2035 = vmatprep.subr.bf16.mxu0 %v2309_v38  ;;  %2057 = vmatprep.subr.bf16.mxu1 %v2310_v39 }
 0x26f   :  { %2036 = vmatpush3.bf16.msra.mxu0 %v2311_v40  ;;  %2058 = vmatpush3.bf16.msra.mxu1 %v2312_v41 }
 0x270   :  { %2037 = vmatprep.subr.bf16.mxu0 %v2313_v42  ;;  %2059 = vmatprep.subr.bf16.mxu1 %v2314_v43 }
 0x273   :  { %2038 = vmatpush3.bf16.msra.mxu0 %v2315_v44  ;;  %2060 = vmatpush3.bf16.msra.mxu1 %v2316_v45 }
 0x274   :  { %2039 = vmatprep.subr.bf16.mxu0 %v2317_v46  ;;  %2061 = vmatprep.subr.bf16.mxu1 %v2318_v47 }
 0x277   :  { %2040 = vmatpush3.bf16.msra.mxu0 %v2319_v48  ;;  %2062 = vmatpush3.bf16.msra.mxu1 %v2320_v49 }
 0x278   :  { %2041 = vmatprep.subr.bf16.mxu0 %v2321_v50  ;;  %2063 = vmatprep.subr.bf16.mxu1 %v2322_v51 }
 0x27b   :  { %2042 = vmatpush3.bf16.msra.mxu0 %v2323_v52  ;;  %2064 = vmatpush3.bf16.msra.mxu1 %v2324_v53 }
 0x31e   :  { %v1420_v57 = vpop.f32.mrf.mxu0  ;;  %v1463_v58 = vpop.f32.mrf.mxu1 }
 0x31f   :  { %v1421_v9 = vadd.f32 %v1420_v57, %v1049_v0  ;;  %v1464_v10 = vadd.f32 %v1463_v58, %v1057_v1 }
 0x320   :  { %v1422_v2 = vpop.f32.mrf.mxu0  ;;  %v1465_v3 = vpop.f32.mrf.mxu1 }
 0x321   :  { %v1423_v17 = vadd.f32 %v1422_v2, %v1053_v59  ;;  %v1466_v6 = vadd.f32 %v1465_v3, %v1061_v63  ;;  %v1472_v19 = vmax.f32 %v1421_v9, 0.0  ;;  %v1474_v20 = vmax.f32 %v1464_v10, 0.0 }
 0x322   :  { %v1424_v4 = vpop.f32.mrf.mxu0  ;;  %v1467_v5 = vpop.f32.mrf.mxu1 }
 0x323   :  { %v1425_v7 = vadd.f32 %v1424_v4, %v1049_v0  ;;  %v1468_v8 = vadd.f32 %v1467_v5, %v1057_v1  ;;  %v1473_v16 = vmax.f32 %v1423_v17, 0.0  ;;  %v1475_v60 = vmax.f32 %v1466_v6, 0.0 }
 0x324   :  { %v1426_v11 = vpop.f32.mrf.mxu0  ;;  %v1469_v12 = vpop.f32.mrf.mxu1 }
 0x325   :  { %v1427_v13 = vadd.f32 %v1426_v11, %v1053_v59  ;;  %v1470_v14 = vadd.f32 %v1469_v12, %v1061_v63  ;;  %v1476_v61 = vmax.f32 %v1425_v7, 0.0  ;;  %v1478_v15 = vmax.f32 %v1468_v8, 0.0 }
 0x327   :  { %v1477_v62 = vmax.f32 %v1427_v13, 0.0  ;;  %v1479_v18 = vmax.f32 %v1470_v14, 0.0  ;;  %v1480_v23 = vpack.c.bf16 %v1476_v61, %v1472_v19  ;;  %v1482_v24 = vpack.c.bf16 %v1478_v15, %v1474_v20 }
 0x329   :  { %v1481_v21 = vpack.c.bf16 %v1477_v62, %v1473_v16  ;;  %v1483_v22 = vpack.c.bf16 %v1479_v18, %v1475_v60 }
 0x32b   :  { %1779 = vmatprep.mubr.bf16.mxu0 %v1481_v21  ;;  %1820 = vmatprep.mubr.bf16.mxu1 %v1483_v22 }
 0x32c   :  { %1780 = vmatmul.mubr.bf16.vlgmr.msra.gmra.mxu0 %v1480_v23  ;;  %1821 = vmatmul.mubr.bf16.vlgmr.msra.gmra.mxu1 %v1482_v24 }
 0x3ec   :  { %v2043_v25 = vpop.f32.mrf.mxu0  ;;  %v2065_v26 = vpop.f32.mrf.mxu1 }
 0x3ee   :  { %v2044_v28 = vpop.f32.mrf.mxu0  ;;  %v2066_v29 = vpop.f32.mrf.mxu1 }
 0x3ef   :  { %v2045_v30 = vadd.f32 %v2044_v28, %v2043_v25  ;;  %v2067_v34 = vadd.f32 %v2066_v29, %v2065_v26 }
 0x3f0   :  { %v2046_v31 = vpop.f32.mrf.mxu0  ;;  %v2068_v32 = vpop.f32.mrf.mxu1 }
 0x3f1   :  { %v1782_v33 = vadd.f32 %v2045_v30, %v1994_v27 }
 0x3f2   :  { %v2047_v35 = vpop.f32.mrf.mxu0  ;;  %v2069_v36 = vpop.f32.mrf.mxu1 }
 0x3f3   :  { %v1823_v37 = vadd.f32 %v2067_v34, %v1782_v33  ;;  %v2048_v38 = vadd.f32 %v2047_v35, %v2046_v31  ;;  %v2070_v40 = vadd.f32 %v2069_v36, %v2068_v32 }
 0x3f5   :  { %1829 = vst [vmem:[#allocation11] sm:$0xff] %v1823_v37  ;;  %v1785_v39 = vadd.f32 %v2048_v38, %v1994_v27 }
 0x3f7   :  { %v1826_v41 = vadd.f32 %v2070_v40, %v1785_v39 }
 0x3f9   :  { %1830 = vst [vmem:[#allocation11 + $0x8] sm:$0xff] %v1826_v41 }
 0x3fa   :  { %2436 = shalt.err (!%p2433_p1)
}
 0x3fb   :  { %1842 = dma.vmem_to_hbm [thread:$0]  %s1837_s11, 256, %s2596_s10, [#allocation4], %s2461_s6, %s2461_s6, %s2462_s14  }
 0x3fc   :  { %2451 = dma.done.wait [#allocation4], 256  }
 0x3fd   :  { %2452 = vsyncadd [#allocation4], 4294967040 }
 0x3fe   :  { %1846 = vsyncpa [#allocation3], 1 }
 0x3ff   :  { %1847 = vsyncpa [#allocation6], 1 }
 0x400   :  { %1848 = vsyncpa [#allocation9], 1 }
 0x401   :  { %1849 = vsyncpa [#allocation4], 1 }

</bundles_post_ra>
